<compile_context>
chip_gen: v7x
topology: tpu7x:2x2x1
jax: 0.10.0
libtpu: 0.0.40
codegen_flags: <defaults>
</compile_context>

<pallas_src>
import functools

import jax
import jax.numpy as jnp
from jax import lax
from jax.experimental import pallas as pl
from jax.experimental.pallas import tpu as pltpu


def _relational_mlp_kernel(x_ref, w1_ref, w2_ref, b2_ref, w3_ref, b3_ref, o_ref,
                           *, chunk):
    # Weights / biases are tiny and resident across the grid; load once per step.
    w1 = w1_ref[...]            # [hid, in_dim+1] bf16 (layer-1 bias folded in)
    w2 = w2_ref[...]            # [hid, hid]      bf16
    w3 = w3_ref[...]            # [out_dim, hid]  bf16
    b2 = b2_ref[...]            # [hid, 1]        f32
    b3 = b3_ref[...]            # [out_dim, 1]    f32

    n_chunks = x_ref.shape[1] // chunk   # static

    def body(c, carry):
        start = pl.multiple_of(c * chunk, chunk)
        x = x_ref[:, pl.ds(start, chunk)]                         # bf16 [in+1, chunk]

        # Linear 1 (+ folded bias) + ReLU.  Dropout(p=0.1) is identity in eval mode.
        h1 = jnp.dot(w1, x, preferred_element_type=jnp.float32)
        h1 = jnp.maximum(h1, 0.0)

        # Linear 2 + bias + ReLU
        h2 = jnp.dot(w2, h1.astype(jnp.bfloat16),
                     preferred_element_type=jnp.float32) + b2
        h2 = jnp.maximum(h2, 0.0)

        # Linear 3 + bias -> lane-dense store [out_dim, chunk]
        out = jnp.dot(w3, h2.astype(jnp.bfloat16),
                      preferred_element_type=jnp.float32) + b3
        o_ref[:, pl.ds(start, chunk)] = out.astype(o_ref.dtype)
        return carry

    # Short, fixed trip count: fully unrolled for LLO scheduler visibility, and
    # each sub-chunk's f32 intermediates stay in-register (no VMEM spill).
    lax.fori_loop(0, n_chunks, body, 0, unroll=True)


def relational_model_forward(m, params, *, tile_n=8192, chunk_n=1024,
                             out_dtype=jnp.float32):
    """Apply the RelationalModel MLP row-wise with a Pallas TPU kernel.

    m:       [N, input_size] float32
    params:  dict with w1 [in,h], b1 [1,h], w2 [h,h], b2 [1,h], w3 [h,out], b3 [1,out]
    returns: [N, output_size] in out_dtype (float32 by default; pass bf16 to halve
             the dominant output HBM stream if downstream tolerates it).
    """
    n, in_dim = m.shape
    hid = params["w1"].shape[1]
    out_dim = params["w3"].shape[1]
    in_aug = in_dim + 1        # ones row carries the folded layer-1 bias

    def _rup(v, q):
        return ((v + q - 1) // q) * q

    # --- tile sizing --------------------------------------------------------
    tile_n = max(128, (tile_n // 128) * 128)
    n128 = _rup(n, 128)
    if n128 >= 256:
        # Guarantee >= 2 grid steps so both v7x TensorCores get work.
        two_step_cap = _rup(pl.cdiv(n128, 2), 128)
        tile = min(tile_n, two_step_cap)
    else:
        tile = 128
    n_pad = _rup(n, tile)
    grid = (n_pad // tile,)

    # Inner lane sub-chunk: largest multiple of 128 dividing `tile`, capped at
    # chunk_n, so h1/h2 stay register-resident per iteration.
    t128 = tile // 128
    dmax = max(1, min(8, chunk_n // 128))
    d = max(i for i in range(1, dmax + 1) if t128 % i == 0)
    chunk = 128 * d

    # --- activation prep (one fused pad/concat/cast/transpose copy under jit) ---
    x_aug = jnp.concatenate([m, jnp.ones((n, 1), m.dtype)], axis=1)   # [N, in+1]
    if n_pad != n:
        x_aug = jnp.pad(x_aug, ((0, n_pad - n), (0, 0)))
    x_t = x_aug.astype(jnp.bfloat16).T                                # [in+1, n_pad]

    # --- weight prep: pre-transposed to [out_feat, in_feat]; layer-1 bias folded ---
    w1_aug = jnp.concatenate([params["w1"], params["b1"].reshape(1, hid)], axis=0)
    w1t = w1_aug.T.astype(jnp.bfloat16)                # [hid, in_dim+1]
    w2t = params["w2"].T.astype(jnp.bfloat16)          # [hid, hid]
    w3t = params["w3"].T.astype(jnp.bfloat16)          # [out_dim, hid]
    b2t = params["b2"].reshape(hid, 1).astype(jnp.float32)
    b3t = params["b3"].reshape(out_dim, 1).astype(jnp.float32)

    out_isz = jnp.dtype(out_dtype).itemsize
    flops = 2 * n_pad * (in_aug * hid + hid * hid + hid * out_dim)
    bytes_accessed = int(x_t.size * 2
                         + n_pad * out_dim * out_isz
                         + (w1t.size + w2t.size + w3t.size) * 2
                         + (b2t.size + b3t.size) * 4)

    # Explicit scoped-VMEM budget sized from the block shapes (double-buffered x/out
    # blocks + resident weights + in-kernel intermediates), clamped to 48 MiB so it
    # fits v7x's 64 MiB physical VMEM and overrides v5e's 16 MiB default scoped limit.
    vmem_bytes = (2 * in_aug * tile * 2
                  + 2 * out_dim * tile * out_isz
                  + 4 * (w1t.size + w2t.size + w3t.size)
                  + 8 * (b2t.size + b3t.size)
                  + 8 * hid * chunk * 4
                  + (2 << 20))
    vmem_limit = int(min(max(vmem_bytes, 16 << 20), 48 << 20))

    kernel = functools.partial(_relational_mlp_kernel, chunk=chunk)

    out_t = pl.pallas_call(
        kernel,
        out_shape=jax.ShapeDtypeStruct((out_dim, n_pad), out_dtype),
        grid=grid,
        in_specs=[
            pl.BlockSpec((in_aug, tile), lambda i: (0, i)),   # x tiles stream
            pl.BlockSpec((hid, in_aug), lambda i: (0, 0)),    # weights resident
            pl.BlockSpec((hid, hid), lambda i: (0, 0)),
            pl.BlockSpec((hid, 1), lambda i: (0, 0)),
            pl.BlockSpec((out_dim, hid), lambda i: (0, 0)),
            pl.BlockSpec((out_dim, 1), lambda i: (0, 0)),
        ],
        out_specs=pl.BlockSpec((out_dim, tile), lambda i: (0, i)),
        compiler_params=pltpu.CompilerParams(
            dimension_semantics=("parallel",),
            vmem_limit_bytes=vmem_limit),
        cost_estimate=pl.CostEstimate(
            flops=flops, transcendentals=0, bytes_accessed=bytes_accessed),
    )(x_t, w1t, w2t, b2t, w3t, b3t)

    # Back to the module's [N, output_size] layout (padded columns sliced off —
    # they carry ReLU(bias) garbage and must not be returned).
    return out_t[:, :n].T


def init_params(key, input_size, output_size, hidden_size):
    """Deterministic init matching PyTorch Linear default: U(-1/sqrt(fan_in), 1/sqrt(fan_in))."""
    ks = jax.random.split(key, 6)

    def lin(kw, kb, fan_in, fan_out):
        bound = 1.0 / jnp.sqrt(fan_in)
        w = jax.random.uniform(kw, (fan_in, fan_out), jnp.float32, -bound, bound)
        b = jax.random.uniform(kb, (1, fan_out), jnp.float32, -bound, bound)
        return w, b

    w1, b1 = lin(ks[0], ks[1], input_size, hidden_size)
    w2, b2 = lin(ks[2], ks[3], hidden_size, hidden_size)
    w3, b3 = lin(ks[4], ks[5], hidden_size, output_size)
    return {"w1": w1, "b1": b1, "w2": w2, "b2": b2, "w3": w3, "b3": b3}


def _reference_forward(m, p):
    # Matches the kernel's numerics: bf16 matmul operands, f32 accumulation,
    # layer-1 bias folded as a bf16 weight row (so it is bf16-rounded too),
    # f32 bias-add / ReLU for layers 2-3.
    x = m.astype(jnp.bfloat16)
    w1 = p["w1"].astype(jnp.bfloat16)
    w2 = p["w2"].astype(jnp.bfloat16)
    w3 = p["w3"].astype(jnp.bfloat16)
    b1 = p["b1"].astype(jnp.bfloat16).astype(jnp.float32)
    h1 = jnp.maximum(jnp.dot(x, w1, preferred_element_type=jnp.float32) + b1, 0.0)
    h2 = jnp.maximum(jnp.dot(h1.astype(jnp.bfloat16), w2,
                             preferred_element_type=jnp.float32) + p["b2"], 0.0)
    return jnp.dot(h2.astype(jnp.bfloat16), w3,
                   preferred_element_type=jnp.float32) + p["b3"]


if __name__ == "__main__":
    # Small shapes consistent with an interaction-network relational model:
    # N relations (edges, deliberately NOT a multiple of 128 to exercise the
    # wrapper-side padding), small per-edge feature vector.
    N = 1000           # number of relations (rows)
    INPUT_SIZE = 6     # e.g. concat of two object states
    HIDDEN_SIZE = 32
    OUTPUT_SIZE = 4    # effect size

    key = jax.random.PRNGKey(0)
    k_m, k_p = jax.random.split(key)

    m = jax.random.normal(k_m, (N, INPUT_SIZE), dtype=jnp.float32)
    params = init_params(k_p, INPUT_SIZE, OUTPUT_SIZE, HIDDEN_SIZE)

    # jit the wrapper so the pre/post passes (concat/pad/cast/transpose and the
    # output slice/transpose) fuse into single copies around the pallas_call.
    forward = jax.jit(lambda mm, pp: relational_model_forward(mm, pp))

    out = jax.block_until_ready(forward(m, params))

    ref = _reference_forward(m, params)
    assert out.shape == (N, OUTPUT_SIZE), out.shape
    assert jnp.allclose(out, ref, atol=1e-2, rtol=1e-2), "mismatch vs reference"

    print("KERNEL_OK")
</pallas_src>

<mosaic_0001>
module attributes {stable_mosaic.version = 11 : i64} {
  func.func @_relational_mlp_kernel(%arg0: i32, %arg1: memref<7x512xbf16, #tpu.memory_space<vmem>>, %arg2: memref<32x7xbf16, #tpu.memory_space<vmem>>, %arg3: memref<32x32xbf16, #tpu.memory_space<vmem>>, %arg4: memref<32x1xf32, #tpu.memory_space<vmem>>, %arg5: memref<4x32xbf16, #tpu.memory_space<vmem>>, %arg6: memref<4x1xf32, #tpu.memory_space<vmem>>, %arg7: memref<4x512xf32, #tpu.memory_space<vmem>>) attributes {dimension_semantics = [#tpu.dimension_semantics<parallel>], iteration_bounds = array<i64: 2>, scalar_prefetch = 0 : i64, scratch_operands = 0 : i64, tpu.core_type = #tpu.core_type<tc>, window_params = [{transform_indices = @transform_0, window_bounds = array<i64: 7, 512>}, {pipeline_mode = #tpu.pipeline_mode<synchronous>, transform_indices = @transform_1, window_bounds = array<i64: 32, 7>}, {pipeline_mode = #tpu.pipeline_mode<synchronous>, transform_indices = @transform_2, window_bounds = array<i64: 32, 32>}, {pipeline_mode = #tpu.pipeline_mode<synchronous>, transform_indices = @transform_3, window_bounds = array<i64: 32, 1>}, {pipeline_mode = #tpu.pipeline_mode<synchronous>, transform_indices = @transform_4, window_bounds = array<i64: 4, 32>}, {pipeline_mode = #tpu.pipeline_mode<synchronous>, transform_indices = @transform_5, window_bounds = array<i64: 4, 1>}, {transform_indices = @transform_6, window_bounds = array<i64: 4, 512>}]} {
    %c0 = arith.constant 0 : index
    %c0_0 = arith.constant 0 : index
    %0 = vector.load %arg2[%c0, %c0_0] : memref<32x7xbf16, #tpu.memory_space<vmem>>, vector<32x7xbf16>
    %c0_1 = arith.constant 0 : index
    %c0_2 = arith.constant 0 : index
    %1 = vector.load %arg3[%c0_1, %c0_2] : memref<32x32xbf16, #tpu.memory_space<vmem>>, vector<32x32xbf16>
    %c0_3 = arith.constant 0 : index
    %c0_4 = arith.constant 0 : index
    %2 = vector.load %arg5[%c0_3, %c0_4] : memref<4x32xbf16, #tpu.memory_space<vmem>>, vector<4x32xbf16>
    %c0_5 = arith.constant 0 : index
    %c0_6 = arith.constant 0 : index
    %3 = vector.load %arg4[%c0_5, %c0_6] : memref<32x1xf32, #tpu.memory_space<vmem>>, vector<32x1xf32>
    %c0_7 = arith.constant 0 : index
    %c0_8 = arith.constant 0 : index
    %4 = vector.load %arg6[%c0_7, %c0_8] : memref<4x1xf32, #tpu.memory_space<vmem>>, vector<4x1xf32>
    %c0_i32 = arith.constant 0 : i32
    %c512_i32 = arith.constant 512 : i32
    %5 = arith.muli %c0_i32, %c512_i32 : i32
    %6 = tpu.assume_multiple %5, 512 : i32
    %c0_9 = arith.constant 0 : index
    %7 = arith.index_cast %6 : i32 to index
    %8 = vector.load %arg1[%c0_9, %7] : memref<7x512xbf16, #tpu.memory_space<vmem>>, vector<7x512xbf16>
    %cst = arith.constant dense<0.000000e+00> : vector<32x512xf32>
    %9 = tpu.matmul %0, %8, %cst {dimension_numbers = #tpu.dot_dimension_numbers<[1], [0], [0], [1], [0, 0, 1, 1], [], []>} : vector<32x7xbf16>, vector<7x512xbf16>, vector<32x512xf32> -> vector<32x512xf32>
    %cst_10 = arith.constant 0.000000e+00 : f32
    %10 = vector.broadcast %cst_10 : f32 to vector<32x512xf32>
    %11 = arith.maximumf %9, %10 : vector<32x512xf32>
    %12 = arith.truncf %11 : vector<32x512xf32> to vector<32x512xbf16>
    %cst_11 = arith.constant dense<0.000000e+00> : vector<32x512xf32>
    %13 = tpu.matmul %1, %12, %cst_11 {dimension_numbers = #tpu.dot_dimension_numbers<[1], [0], [0], [1], [0, 0, 1, 1], [], []>} : vector<32x32xbf16>, vector<32x512xbf16>, vector<32x512xf32> -> vector<32x512xf32>
    %14 = vector.broadcast %3 : vector<32x1xf32> to vector<32x512xf32>
    %15 = arith.addf %13, %14 : vector<32x512xf32>
    %cst_12 = arith.constant 0.000000e+00 : f32
    %16 = vector.broadcast %cst_12 : f32 to vector<32x512xf32>
    %17 = arith.maximumf %15, %16 : vector<32x512xf32>
    %18 = arith.truncf %17 : vector<32x512xf32> to vector<32x512xbf16>
    %cst_13 = arith.constant dense<0.000000e+00> : vector<4x512xf32>
    %19 = tpu.matmul %2, %18, %cst_13 {dimension_numbers = #tpu.dot_dimension_numbers<[1], [0], [0], [1], [0, 0, 1, 1], [], []>} : vector<4x32xbf16>, vector<32x512xbf16>, vector<4x512xf32> -> vector<4x512xf32>
    %20 = vector.broadcast %4 : vector<4x1xf32> to vector<4x512xf32>
    %21 = arith.addf %19, %20 : vector<4x512xf32>
    %c0_14 = arith.constant 0 : index
    %22 = arith.index_cast %6 : i32 to index
    %23 = vector.load %arg7[%c0_14, %22] : memref<4x512xf32, #tpu.memory_space<vmem>>, vector<4x512xf32>
    tpu.vector_store %arg7[%c0_14, %22], %21 {strides = array<i32>} : memref<4x512xf32, #tpu.memory_space<vmem>>, vector<4x512xf32>,
    %c1_i32 = arith.constant 1 : i32
    return
  }
  func.func @transform_0(%arg0: i32) -> (i32, i32) {
    %c0_i32 = arith.constant 0 : i32
    %c0_i32_0 = arith.constant 0 : i32
    return %c0_i32, %arg0 : i32, i32
  }
  func.func @transform_1(%arg0: i32) -> (i32, i32) {
    %c0_i32 = arith.constant 0 : i32
    %c0_i32_0 = arith.constant 0 : i32
    %c0_i32_1 = arith.constant 0 : i32
    return %c0_i32, %c0_i32_0 : i32, i32
  }
  func.func @transform_2(%arg0: i32) -> (i32, i32) {
    %c0_i32 = arith.constant 0 : i32
    %c0_i32_0 = arith.constant 0 : i32
    %c0_i32_1 = arith.constant 0 : i32
    return %c0_i32, %c0_i32_0 : i32, i32
  }
  func.func @transform_3(%arg0: i32) -> (i32, i32) {
    %c0_i32 = arith.constant 0 : i32
    %c0_i32_0 = arith.constant 0 : i32
    %c0_i32_1 = arith.constant 0 : i32
    return %c0_i32, %c0_i32_0 : i32, i32
  }
  func.func @transform_4(%arg0: i32) -> (i32, i32) {
    %c0_i32 = arith.constant 0 : i32
    %c0_i32_0 = arith.constant 0 : i32
    %c0_i32_1 = arith.constant 0 : i32
    return %c0_i32, %c0_i32_0 : i32, i32
  }
  func.func @transform_5(%arg0: i32) -> (i32, i32) {
    %c0_i32 = arith.constant 0 : i32
    %c0_i32_0 = arith.constant 0 : i32
    %c0_i32_1 = arith.constant 0 : i32
    return %c0_i32, %c0_i32_0 : i32, i32
  }
  func.func @transform_6(%arg0: i32) -> (i32, i32) {
    %c0_i32 = arith.constant 0 : i32
    %c0_i32_0 = arith.constant 0 : i32
    return %c0_i32, %arg0 : i32, i32
  }
}

</mosaic_0001>

<bundles_post_ra>
// kernel: _lambda_.1
= control target key start
LH: loop header
LB: loop body
LE: loop exit
PB: predicated region body
PF: predicated region fallthrough
CT: control target
= control target key end

     0   :  { %s862_s21 = smov 0   ;;  %s934_s0 = inlined_call_operand.vmem [shape: bf16[7,1024], index: 0, kind: input, shape index: {}]   ;;  %s935_s1 = inlined_call_operand.vmem [shape: bf16[32,7], index: 1, kind: input, shape index: {}]   ;;  %s936_s2 = inlined_call_operand.vmem [shape: bf16[32,32], index: 2, kind: input, shape index: {}]   ;;  %s937_s3 = inlined_call_operand.vmem [shape: f32[32,1], index: 3, kind: input, shape index: {}]   ;;  %s938_s4 = inlined_call_operand.vmem [shape: bf16[4,32], index: 4, kind: input, shape index: {}]   ;;  %s939_s5 = inlined_call_operand.vmem [shape: f32[4,1], index: 5, kind: input, shape index: {}]   ;;  %s940_s6 = inlined_call_operand.vmem [shape: f32[4,1024], index: 6, kind: output, shape index: {}]  }
   0x1 LB: > { %s768_s22 = sadd.s32 4294967295, %s823_s21   ;;  %p772_p0 = scmp.ge.s32.totalorder %s823_s21, 1  ;;  %s823_s21 = sphi %s862_s21, %s16_s21  }
   0x2   : > { %p213_p1 = scmp.lt.s32.totalorder %s823_s21, 3 }
   0x4   : > { %p214_p2 = pnand %p772_p0, %p213_p1 }
   0x5   : > { %s773_s23 = sshll.u32 (!%p214_p2), %s768_s22, 2  ;;  %vm299_vm0 = vcmask (!%p214_p2), 1042432   ;;  %v825_v0 = vmov (!%p214_p2), 0   ;;  %vm300_vm1 = vcmask (!%p214_p2), 1043456   ;;  %v826_v1 = vmov (!%p214_p2), 65535   ;;  %v813_v14 = vld [vmem:[%s935_s1] sm:$0xff] (!%p214_p2)  }
   0x6   : > { %217 = sbr.rel (%p214_p2) target bundleno = 707 (0x2c3), region = 44  ;;  %p244_p3 = scmp.lt.s32.totalorder (!%p214_p2), %s773_s23, 7  ;;  %347 = vmatprep.mubr.bf16.mxu0 (!%p214_p2), %v825_v0  ;;  %400 = vmatprep.mubr.bf16.mxu1 (!%p214_p2), %v825_v0  ;;  %v301_v2 = vsel (!%p214_p2), %vm299_vm0, 4294967295, %v826_v1  ;;  %vm292_vm2 = vcmask (!%p214_p2), 56320   ;;  %v814_v15 = vld [vmem:[%s935_s1 + $0x8] sm:$0xff] (!%p214_p2)   ;;  %v265_v16 = vld [vmem:[%s937_s3] sm:$0xff] (!%p214_p2) }
   0x7   : > { %807 = vset.pattern.permute.xlu0 (!%p214_p2), %v825_v0  ;;  %808 = vset.pattern.permute.xlu1 (!%p214_p2), %v825_v0  ;;  %v302_v4 = vsel (!%p214_p2), %vm300_vm1, %v301_v2, 0  ;;  %v267_v17 = vld [vmem:[%s937_s3 + $0x10] sm:$0xff] (!%p214_p2)  ;;  %v266_v18 = vld [vmem:[%s937_s3 + $0x8] sm:$0xff] (!%p214_p2)  ;;  %v268_v19 = vld [vmem:[%s937_s3 + $0x18] sm:$0xff] (!%p214_p2)  ;;  %vm475_vm3 = vcmask (!%p214_p2), 261120  }
   0x8   : > { %447 = vperm.xlu0 (!%p214_p2), %807, %v265_v16   ;;  %457 = vperm.xlu1 (!%p214_p2), %808, %v267_v17   ;;  %v269_v20 = vld [vmem:[%s939_s5] sm:$0xf] (!%p214_p2)  ;;  %v816_v62 = vld [vmem:[%s936_s2 + $0x8] sm:$0xff] (!%p214_p2)  }
   0x9   : > { %v815_v61 = vld [vmem:[%s936_s2] sm:$0xff] (!%p214_p2)  }
   0xc   : > { %452 = vperm.xlu0 (!%p214_p2), %807, %v266_v18   ;;  %462 = vperm.xlu1 (!%p214_p2), %808, %v268_v19  }
   0xd   : > { %s942_s23 = smov (!%p244_p3, %s773_s23), 7 }
   0xe   : > { %s774_s24 = sshll.u32 %s942_s23, 2 }
   0xf   : > { %s247_s27 = scalar_lea.vmem %s934_s0, %s774_s24  ;;  %s253_s29 = scalar_lea.vmem %s940_s6, %s774_s24 }
  0x10   : > { %v270_v3 = vld [vmem:[%s247_s27] sm:$0xff]  ;;  %v271_v5 = vld [vmem:[%s247_s27 + $0x8] sm:$0xff]  ;;  %614 = vperm.xlu0 %807, %v269_v20  }
  0x11   : > { %v780_v6 = vcombine.high %v270_v3, %v270_v3  ;;  %v782_v7 = vcombine.high %v271_v5, %v271_v5  ;;  %v779_v8 = vcombine.low %v270_v3, %v270_v3  ;;  %v781_v9 = vcombine.low %v271_v5, %v271_v5 }
  0x13   : > { %v307_v10 = vand.u32 %v780_v6, %v302_v4  ;;  %v313_v11 = vand.u32 %v782_v7, %v302_v4  ;;  %v304_v12 = vand.u32 %v779_v8, %v302_v4  ;;  %v310_v13 = vand.u32 %v781_v9, %v302_v4 }
  0x15   : > { %315 = vmatprep.subr.bf16.mxu0 %v307_v10  ;;  %368 = vmatprep.subr.bf16.mxu1 %v313_v11 }
  0x16   : > { %316 = vmatpush1.bf16.msra.mxu0 %v304_v12  ;;  %369 = vmatpush1.bf16.msra.mxu1 %v310_v13 }
  0x19   : > { %783 = vmatmul.mubr.msk.bf16.vlgmr.msra.gmra.mrb[0].mxu0 %vm292_vm2, %v813_v14  ;;  %785 = vmatmul.mubr.msk.bf16.vlgmr.msra.gmra.mrb[0].mxu1 %vm292_vm2, %v813_v14 }
  0x1a   : > { %357 = vmatprep.mubr.bf16.mxu0 %v825_v0  ;;  %410 = vmatprep.mubr.bf16.mxu1 %v825_v0 }
  0x21   : > { %784 = vmatmul.mubr.msk.bf16.gmra.mrb[4].mxu0 %vm292_vm2, %v814_v15  ;;  %786 = vmatmul.mubr.msk.bf16.gmra.mrb[4].mxu1 %vm292_vm2, %v814_v15 }
  0x22   : > { %514 = vmatprep.mubr.bf16.mxu0 %v825_v0  ;;  %567 = vmatprep.mubr.bf16.mxu1 %v825_v0 }
  0x87   : > { %v448_v63 = vpop.permute.xlu0 %447  ;;  %v458_v2 = vpop.permute.xlu1 %457 }
  0x8b   : > { %v453_v1 = vpop.permute.xlu0 %452 }
  0xec   : > { %v349_v21 = vpop.f32.mrb[0].mxu0  ;;  %v402_v22 = vpop.f32.mrb[0].mxu1 }
  0xed   : > { %v423_v23 = vmax.f32 %v402_v22, 0.0  ;;  %v351_v24 = vpop.f32.mrb[1].mxu0  ;;  %v404_v25 = vpop.f32.mrb[1].mxu1  ;;  %v421_v28 = vmax.f32 %v349_v21, 0.0 }
  0xee   : > { %v353_v26 = vpop.f32.mrb[2].mxu0  ;;  %v406_v27 = vpop.f32.mrb[2].mxu1  ;;  %v422_v33 = vmax.f32 %v351_v24, 0.0  ;;  %v424_v34 = vmax.f32 %v404_v25, 0.0 }
  0xef   : > { %v425_v29 = vmax.f32 %v353_v26, 0.0  ;;  %v427_v30 = vmax.f32 %v406_v27, 0.0  ;;  %v355_v31 = vpop.f32.mrb[3].mxu0  ;;  %v408_v32 = vpop.f32.mrb[3].mxu1 }
  0xf0   : > { %v426_v35 = vmax.f32 %v355_v31, 0.0  ;;  %v428_v36 = vmax.f32 %v408_v32, 0.0 }
  0xf1   : > { %v437_v37 = vpack.c.bf16 %v425_v29, %v421_v28  ;;  %v439_v38 = vpack.c.bf16 %v427_v30, %v423_v23  ;;  %v463_v28 = vpop.permute.xlu1 %462 }
  0xf2   : > { %v438_v39 = vpack.c.bf16 %v426_v35, %v422_v33  ;;  %v440_v40 = vpack.c.bf16 %v428_v36, %v424_v34 }
  0xf4   : > { %v359_v41 = vpop.f32.mrb[4].mxu0  ;;  %v412_v42 = vpop.f32.mrb[4].mxu1  ;;  %482 = vmatprep.subr.bf16.mxu0 %v438_v39  ;;  %535 = vmatprep.subr.bf16.mxu1 %v440_v40 }
  0xf5   : > { %v431_v43 = vmax.f32 %v412_v42, 0.0  ;;  %v361_v44 = vpop.f32.mrb[5].mxu0  ;;  %v414_v45 = vpop.f32.mrb[5].mxu1  ;;  %483 = vmatpush1.bf16.msra.mxu0 %v437_v37  ;;  %536 = vmatpush1.bf16.msra.mxu1 %v439_v38  ;;  %v429_v48 = vmax.f32 %v359_v41, 0.0 }
  0xf6   : > { %v363_v46 = vpop.f32.mrb[6].mxu0  ;;  %v416_v47 = vpop.f32.mrb[6].mxu1  ;;  %v430_v53 = vmax.f32 %v361_v44, 0.0  ;;  %v432_v54 = vmax.f32 %v414_v45, 0.0 }
  0xf7   : > { %v433_v49 = vmax.f32 %v363_v46, 0.0  ;;  %v435_v50 = vmax.f32 %v416_v47, 0.0  ;;  %v365_v51 = vpop.f32.mrb[7].mxu0  ;;  %v418_v52 = vpop.f32.mrb[7].mxu1 }
  0xf8   : > { %v434_v55 = vmax.f32 %v365_v51, 0.0  ;;  %v436_v56 = vmax.f32 %v418_v52, 0.0 }
  0xf9   : > { %v441_v57 = vpack.c.bf16 %v433_v49, %v429_v48  ;;  %v443_v58 = vpack.c.bf16 %v435_v50, %v431_v43 }
  0xfa   : > { %v442_v59 = vpack.c.bf16 %v434_v55, %v430_v53  ;;  %v444_v60 = vpack.c.bf16 %v436_v56, %v432_v54 }
  0xfc   : > { %484 = vmatprep.subr.bf16.mxu0 %v442_v59  ;;  %537 = vmatprep.subr.bf16.mxu1 %v444_v60  ;;  %v264_v59 = vld [vmem:[%s938_s4] sm:$0x3]  ;;  %v615_v60 = vpop.permute.xlu0 %614 }
  0xfd   : > { %485 = vmatpush1.bf16.msra.mxu0 %v441_v57  ;;  %538 = vmatpush1.bf16.msra.mxu1 %v443_v58 }
 0x100   : > { %789 = vmatmul.mubr.msk.bf16.vlgmr.msra.gmra.mrb[8].mxu0 %vm475_vm3, %v815_v61  ;;  %791 = vmatmul.mubr.msk.bf16.vlgmr.msra.gmra.mrb[8].mxu1 %vm475_vm3, %v815_v61 }
 0x101   : > { %524 = vmatprep.mubr.bf16.mxu0 %v825_v0  ;;  %577 = vmatprep.mubr.bf16.mxu1 %v825_v0 }
 0x108   : > { %790 = vmatmul.mubr.msk.bf16.gmra.mrb[12].mxu0 %vm475_vm3, %v816_v62  ;;  %792 = vmatmul.mubr.msk.bf16.gmra.mrb[12].mxu1 %vm475_vm3, %v816_v62 }
 0x109   : > { %652 = vmatprep.mubr.bf16.mxu0 %v825_v0  ;;  %693 = vmatprep.mubr.bf16.mxu1 %v825_v0 }
 0x1d3   : > { %v516_v3 = vpop.f32.mrb[8].mxu0  ;;  %v569_v4 = vpop.f32.mrb[8].mxu1 }
 0x1d4   : > { %v517_v5 = vadd.f32 %v516_v3, %v448_v63  ;;  %v570_v6 = vadd.f32 %v569_v4, %v448_v63  ;;  %v518_v7 = vpop.f32.mrb[9].mxu0  ;;  %v571_v8 = vpop.f32.mrb[9].mxu1 }
 0x1d5   : > { %v519_v9 = vadd.f32 %v518_v7, %v448_v63  ;;  %v572_v10 = vadd.f32 %v571_v8, %v448_v63  ;;  %v520_v11 = vpop.f32.mrb[10].mxu0  ;;  %v573_v12 = vpop.f32.mrb[10].mxu1 }
 0x1d6   : > { %v590_v13 = vmax.f32 %v570_v6, 0.0  ;;  %v521_v14 = vadd.f32 %v520_v11, %v453_v1  ;;  %v574_v15 = vadd.f32 %v573_v12, %v453_v1  ;;  %v522_v16 = vpop.f32.mrb[11].mxu0  ;;  %v575_v17 = vpop.f32.mrb[11].mxu1  ;;  %v588_v19 = vmax.f32 %v517_v5, 0.0 }
 0x1d7   : > { %v523_v18 = vadd.f32 %v522_v16, %v453_v1  ;;  %v576_v0 = vadd.f32 %v575_v17, %v453_v1  ;;  %v589_v22 = vmax.f32 %v519_v9, 0.0  ;;  %v591_v23 = vmax.f32 %v572_v10, 0.0 }
 0x1d8   : > { %v592_v20 = vmax.f32 %v521_v14, 0.0  ;;  %v594_v21 = vmax.f32 %v574_v15, 0.0 }
 0x1d9   : > { %v593_v24 = vmax.f32 %v523_v18, 0.0  ;;  %v595_v25 = vmax.f32 %v576_v0, 0.0 }
 0x1da   : > { %v604_v26 = vpack.c.bf16 %v592_v20, %v588_v19  ;;  %v606_v27 = vpack.c.bf16 %v594_v21, %v590_v13 }
 0x1db   : > { %v605_v29 = vpack.c.bf16 %v593_v24, %v589_v22  ;;  %v607_v30 = vpack.c.bf16 %v595_v25, %v591_v23  ;;  %v526_v31 = vpop.f32.mrb[12].mxu0  ;;  %v579_v32 = vpop.f32.mrb[12].mxu1 }
 0x1dc   : > { %v527_v33 = vadd.f32 %v526_v31, %v458_v2  ;;  %v580_v34 = vadd.f32 %v579_v32, %v458_v2  ;;  %v528_v35 = vpop.f32.mrb[13].mxu0  ;;  %v581_v36 = vpop.f32.mrb[13].mxu1 }
 0x1dd   : > { %v529_v37 = vadd.f32 %v528_v35, %v458_v2  ;;  %v582_v38 = vadd.f32 %v581_v36, %v458_v2  ;;  %v530_v39 = vpop.f32.mrb[14].mxu0  ;;  %v583_v40 = vpop.f32.mrb[14].mxu1  ;;  %620 = vmatprep.subr.bf16.mxu0 %v605_v29  ;;  %661 = vmatprep.subr.bf16.mxu1 %v607_v30 }
 0x1de   : > { %v531_v41 = vadd.f32 %v530_v39, %v463_v28  ;;  %v584_v42 = vadd.f32 %v583_v40, %v463_v28  ;;  %v532_v43 = vpop.f32.mrb[15].mxu0  ;;  %v585_v44 = vpop.f32.mrb[15].mxu1  ;;  %621 = vmatpush1.bf16.msra.mxu0 %v604_v26  ;;  %662 = vmatpush1.bf16.msra.mxu1 %v606_v27  ;;  %v596_v47 = vmax.f32 %v527_v33, 0.0  ;;  %v598_v48 = vmax.f32 %v580_v34, 0.0 }
 0x1df   : > { %v533_v45 = vadd.f32 %v532_v43, %v463_v28  ;;  %v586_v46 = vadd.f32 %v585_v44, %v463_v28  ;;  %v597_v51 = vmax.f32 %v529_v37, 0.0  ;;  %v599_v52 = vmax.f32 %v582_v38, 0.0 }
 0x1e0   : > { %v600_v49 = vmax.f32 %v531_v41, 0.0  ;;  %v602_v50 = vmax.f32 %v584_v42, 0.0 }
 0x1e1   : > { %v601_v53 = vmax.f32 %v533_v45, 0.0  ;;  %v603_v54 = vmax.f32 %v586_v46, 0.0 }
 0x1e2   : > { %v608_v55 = vpack.c.bf16 %v600_v49, %v596_v47  ;;  %v610_v56 = vpack.c.bf16 %v602_v50, %v598_v48 }
 0x1e3   : > { %v609_v57 = vpack.c.bf16 %v601_v53, %v597_v51  ;;  %v611_v58 = vpack.c.bf16 %v603_v54, %v599_v52 }
 0x1e5   : > { %622 = vmatprep.subr.bf16.mxu0 %v609_v57  ;;  %663 = vmatprep.subr.bf16.mxu1 %v611_v58 }
 0x1e6   : > { %623 = vmatpush1.bf16.msra.mxu0 %v608_v55  ;;  %664 = vmatpush1.bf16.msra.mxu1 %v610_v56 }
 0x1e9   : > { %793 = vmatmul.mubr.msk.bf16.vlgmr.msra.gmra.mrb[16].mxu0 %vm475_vm3, %v264_v59  ;;  %794 = vmatmul.mubr.msk.bf16.vlgmr.msra.gmra.mrb[16].mxu1 %vm475_vm3, %v264_v59 }
 0x2bc   : > { %v654_v61 = vpop.f32.mrb[16].mxu0  ;;  %v695_v62 = vpop.f32.mrb[16].mxu1 }
 0x2bd   : > { %v655_v63 = vadd.f32 %v654_v61, %v615_v60  ;;  %v696_v1 = vadd.f32 %v695_v62, %v615_v60  ;;  %v656_v2 = vpop.f32.mrb[17].mxu0  ;;  %v697_v3 = vpop.f32.mrb[17].mxu1 }
 0x2be   : > { %v657_v4 = vadd.f32 %v656_v2, %v615_v60  ;;  %v698_v5 = vadd.f32 %v697_v3, %v615_v60  ;;  %v658_v6 = vpop.f32.mrb[18].mxu0  ;;  %v699_v7 = vpop.f32.mrb[18].mxu1 }
 0x2bf   : > { %v659_v8 = vpop.f32.mrb[19].mxu0  ;;  %v700_v9 = vpop.f32.mrb[19].mxu1 }
 0x2c0   : > { %v706_v10 = vcombine.low %v655_v63, %v657_v4  ;;  %v707_v11 = vcombine.low %v696_v1, %v698_v5 }
 0x2c2   : > { %710 = vst [vmem:[%s253_s29] sm:$0xff] %v706_v10  ;;  %711 = vst [vmem:[%s253_s29 + $0x8] sm:$0xff] %v707_v11 }
 0x2c3 PF: > { %s16_s21 = sadd.s32 1, %s823_s21  }
 0x2c4   : > { %p13_p4 = scmp.ge.s32.totalorder %s16_s21, 4  }
 0x2c6   :  { %15 = sbr.rel (!%p13_p4) target bundleno = 1 (0x1), region = 74 }

</bundles_post_ra>
